<compile_context>
chip_gen: v7x
topology: tpu7x:2x2x1
jax: 0.10.0
libtpu: 0.0.40
codegen_flags: <defaults>
</compile_context>

<pallas_src>
import jax
import jax.numpy as jnp
from jax.experimental import pallas as pl
from jax.experimental.pallas import tpu as pltpu

IN_FEATURES = 28 * 28   # 784
OUT_FEATURES = 10
N_PAD = 128             # lane-dense padded width for the in-VMEM accumulator / W


def _round_up(x, m):
    return ((x + m - 1) // m) * m


def linear_clamp_kernel(x_ref, w_ref, b_ref, o_ref):
    # x_ref : (TB, 784)    VMEM, f32 (streamed per grid step)
    # w_ref : (784, 128)   VMEM, f32 (resident; zero-padded cols 10..127)
    # b_ref : (1, 128)     VMEM, f32 (resident; zero-padded cols 10..127)
    # o_ref : (TB, 10)     VMEM, f32 (narrow HBM writeback)
    acc = jnp.dot(x_ref[...], w_ref[...], preferred_element_type=jnp.float32)
    acc = acc + b_ref[...]
    # clamp_min(-15.0) then clamp_max(15.0)
    acc = jnp.maximum(acc, -15.0)
    acc = jnp.minimum(acc, 15.0)
    o_ref[...] = acc[:, :OUT_FEATURES]


def prepare_params(w, b):
    """One-time layout plumbing for the static parameters.

    w: (10, 784) f32 PyTorch layout -> (784, 128) f32, zero-padded cols.
    b: (10,)     f32                -> (1, 128)   f32, zero-padded cols.
    """
    w_p = jnp.zeros((IN_FEATURES, N_PAD), dtype=jnp.float32)
    w_p = w_p.at[:, :OUT_FEATURES].set(w.T.astype(jnp.float32))
    b_p = jnp.zeros((1, N_PAD), dtype=jnp.float32)
    b_p = b_p.at[0, :OUT_FEATURES].set(b.astype(jnp.float32))
    return w_p, b_p


def linear_clamp(x, w_p, b_p, *, block_b=1024):
    """x: (B, 784) f32, w_p: (784, 128) f32, b_p: (1, 128) f32 -> (B, 10) f32."""
    B = x.shape[0]

    # Batch tile: sublane-aligned, at most block_b, and capped at ~ceil(B/2)
    # so a 2-TensorCore chip gets >= 2 grid steps for large B.
    half = pl.cdiv(B, 2)
    TB = max(8, min(block_b, _round_up(half, 8)))
    grid = (pl.cdiv(B, TB),)

    out = pl.pallas_call(
        linear_clamp_kernel,
        out_shape=jax.ShapeDtypeStruct((B, OUT_FEATURES), jnp.float32),
        grid=grid,
        in_specs=[
            pl.BlockSpec((TB, IN_FEATURES), lambda i: (i, 0)),      # x tile streams
            pl.BlockSpec((IN_FEATURES, N_PAD), lambda i: (0, 0)),   # W resident
            pl.BlockSpec((1, N_PAD), lambda i: (0, 0)),             # bias resident
        ],
        out_specs=pl.BlockSpec((TB, OUT_FEATURES), lambda i: (i, 0)),
        compiler_params=pltpu.CompilerParams(
            dimension_semantics=("parallel",),   # megacore-shardable batch axis
        ),
    )(x, w_p, b_p)

    return out


def reference(x, w, b):
    # Full-precision f32 reference matching the PyTorch module semantics.
    y = jnp.dot(x, w.T, precision=jax.lax.Precision.HIGHEST) + b
    return jnp.clip(y, -15.0, 15.0)


if __name__ == "__main__":
    key = jax.random.PRNGKey(0)
    kx, kw, kb = jax.random.split(key, 3)

    # Input matching the module: torch.rand(1, 28*28) -> uniform [0, 1)
    x = jax.random.uniform(kx, (1, IN_FEATURES), dtype=jnp.float32)

    # Deterministic params (PyTorch Linear default: U(-1/sqrt(fan_in), 1/sqrt(fan_in)))
    bound = 1.0 / jnp.sqrt(jnp.float32(IN_FEATURES))
    w = jax.random.uniform(kw, (OUT_FEATURES, IN_FEATURES), dtype=jnp.float32,
                           minval=-bound, maxval=bound)
    b = jax.random.uniform(kb, (OUT_FEATURES,), dtype=jnp.float32,
                           minval=-bound, maxval=bound)

    # One-time parameter layout plumbing (reused across calls).
    w_p, b_p = prepare_params(w, b)

    out = linear_clamp(x, w_p, b_p)
    out = jax.block_until_ready(out)

    ref = reference(x, w, b)
    assert out.shape == (1, OUT_FEATURES)
    assert jnp.allclose(out, ref, atol=1e-3, rtol=1e-3), "mismatch vs reference"

    print("KERNEL_OK")
</pallas_src>

<mosaic_0001>
module attributes {stable_mosaic.version = 11 : i64} {
  func.func @linear_clamp_kernel(%arg0: i32, %arg1: memref<8x784xf32, #tpu.memory_space<vmem>>, %arg2: memref<784x128xf32, #tpu.memory_space<vmem>>, %arg3: memref<1x128xf32, #tpu.memory_space<vmem>>, %arg4: memref<8x10xf32, #tpu.memory_space<vmem>>) attributes {dimension_semantics = [#tpu.dimension_semantics<parallel>], iteration_bounds = array<i64: 1>, scalar_prefetch = 0 : i64, scratch_operands = 0 : i64, tpu.core_type = #tpu.core_type<tc>, window_params = [{transform_indices = @transform_0, window_bounds = array<i64: 8, 784>}, {pipeline_mode = #tpu.pipeline_mode<synchronous>, transform_indices = @transform_1, window_bounds = array<i64: 784, 128>}, {pipeline_mode = #tpu.pipeline_mode<synchronous>, transform_indices = @transform_2, window_bounds = array<i64: 1, 128>}, {transform_indices = @transform_3, window_bounds = array<i64: 8, 10>}]} {
    %c0 = arith.constant 0 : index
    %c0_0 = arith.constant 0 : index
    %0 = vector.load %arg1[%c0, %c0_0] : memref<8x784xf32, #tpu.memory_space<vmem>>, vector<8x784xf32>
    %c0_1 = arith.constant 0 : index
    %c0_2 = arith.constant 0 : index
    %1 = vector.load %arg2[%c0_1, %c0_2] : memref<784x128xf32, #tpu.memory_space<vmem>>, vector<784x128xf32>
    %cst = arith.constant dense<0.000000e+00> : vector<8x128xf32>
    %2 = tpu.matmul %0, %1, %cst {dimension_numbers = #tpu.dot_dimension_numbers<[1], [0], [0], [1], [0, 0, 1, 1], [], []>} : vector<8x784xf32>, vector<784x128xf32>, vector<8x128xf32> -> vector<8x128xf32>
    %c0_3 = arith.constant 0 : index
    %c0_4 = arith.constant 0 : index
    %3 = vector.load %arg3[%c0_3, %c0_4] : memref<1x128xf32, #tpu.memory_space<vmem>>, vector<1x128xf32>
    %4 = vector.broadcast %3 : vector<1x128xf32> to vector<8x128xf32>
    %5 = arith.addf %2, %4 : vector<8x128xf32>
    %cst_5 = arith.constant -1.500000e+01 : f32
    %6 = vector.broadcast %cst_5 : f32 to vector<8x128xf32>
    %7 = arith.maximumf %5, %6 : vector<8x128xf32>
    %cst_6 = arith.constant 1.500000e+01 : f32
    %8 = vector.broadcast %cst_6 : f32 to vector<8x128xf32>
    %9 = arith.minimumf %7, %8 : vector<8x128xf32>
    %10 = vector.extract_strided_slice %9 {offsets = [0, 0], sizes = [8, 10], strides = [1, 1]} : vector<8x128xf32> to vector<8x10xf32>
    %c0_7 = arith.constant 0 : index
    %c0_8 = arith.constant 0 : index
    %11 = vector.load %arg4[%c0_7, %c0_8] : memref<8x10xf32, #tpu.memory_space<vmem>>, vector<8x10xf32>
    tpu.vector_store %arg4[%c0_7, %c0_8], %10 {strides = array<i32>} : memref<8x10xf32, #tpu.memory_space<vmem>>, vector<8x10xf32>,
    return
  }
  func.func @transform_0(%arg0: i32) -> (i32, i32) {
    %c0_i32 = arith.constant 0 : i32
    %c0_i32_0 = arith.constant 0 : i32
    return %arg0, %c0_i32 : i32, i32
  }
  func.func @transform_1(%arg0: i32) -> (i32, i32) {
    %c0_i32 = arith.constant 0 : i32
    %c0_i32_0 = arith.constant 0 : i32
    %c0_i32_1 = arith.constant 0 : i32
    return %c0_i32, %c0_i32_0 : i32, i32
  }
  func.func @transform_2(%arg0: i32) -> (i32, i32) {
    %c0_i32 = arith.constant 0 : i32
    %c0_i32_0 = arith.constant 0 : i32
    %c0_i32_1 = arith.constant 0 : i32
    return %c0_i32, %c0_i32_0 : i32, i32
  }
  func.func @transform_3(%arg0: i32) -> (i32, i32) {
    %c0_i32 = arith.constant 0 : i32
    %c0_i32_0 = arith.constant 0 : i32
    return %arg0, %c0_i32 : i32, i32
  }
}

</mosaic_0001>

<bundles_post_ra>
// kernel: tpu_custom_call.1
= control target key start
LH: loop header
LB: loop body
LE: loop exit
PB: predicated region body
PF: predicated region fallthrough
CT: control target
= control target key end

     0   :  { %8 = vsyncpa [#allocation3], 0  ;;  %s1014_s0 = inlined_call_operand.hbm [shape: f32[1,784], index: 0, kind: input, shape index: {}]   ;;  %s1015_s1 = inlined_call_operand.hbm [shape: f32[784,128], index: 1, kind: input, shape index: {}]   ;;  %s1016_s2 = inlined_call_operand.vmem [shape: f32[1,128], index: 2, kind: input, shape index: {}]   ;;  %s1017_s3 = inlined_call_operand.hbm [shape: f32[1,10], index: 3, kind: output, shape index: {}]  }
   0x1   :  { %9 = vsyncpa [#allocation6], 0 }
   0x2   :  { %10 = vsyncpa [#allocation4], 0 }
   0x3   :  { %15 = vsyncadd [#allocation3], 784  ;;  %s924_s12 = smov [#allocation2]   ;;  %s852_s16 = scalar_lea.hbm %s1014_s0, 112 }
   0x4   :  { %s16_s13 = sshll.u32 %s924_s12, 4  ;;  %p853_p0 = scmp.ne.s32.totalorder %s1014_s0, %s852_s16  ;;  %s17_s13 = int_to_ptr.vmem [resolvable:$true] %s16_s13 }
   0x5   :  { %p856_p1 = scmp.lt.u32.totalorder %s852_s16, %s1014_s0 }
   0x7   :  { %p858_p2 = pnand %p856_p1, %p853_p0 }
   0x9   :  { %861 = shalt.err (!%p858_p2)
}
   0xa   :  { %s862_s21 = scalar_lea.vmem %s17_s13, 112  ;;  %s866_s22 = scalar_lea.vmem %s17_s13, 896 }
   0xb   :  { %p863_p3 = scmp.ne.s32.totalorder %s17_s13, %s862_s21  ;;  %p867_p4 = scmp.lt.s32.totalorder %s17_s13, %s17_s13 }
   0xc   :  { %p868_p5 = scmp.lt.s32.totalorder %s866_s22, %s862_s21 }
   0xe   :  { %p869_p6 = por %p868_p5, %p867_p4 }
  0x10   :  { %p870_p7 = pnand %p869_p6, %p863_p3 }
  0x12   :  { %873 = shalt.err (!%p870_p7)
}
  0x13   :  { %s925_s23 = smov 112   ;;  %s926_s24 = smov 7  }
  0x14   :  { %22 = dma.hbm_to_vmem [thread:$0]  %s1014_s0, 112, %s17_s13, [#allocation3], %s925_s23, %s925_s23, %s926_s24  }
  0x15   :  { %s927_s27 = smov [#allocation5]   ;;  %s874_s4 = scalar_lea.hbm %s1015_s1, 12544 }
  0x16   :  { %s28_s28 = sshll.u32 %s927_s27, 4  ;;  %p875_p8 = scmp.ne.s32.totalorder %s1015_s1, %s874_s4  ;;  %s29_s28 = int_to_ptr.vmem [resolvable:$true] %s28_s28 }
  0x17   :  { %p878_p9 = scmp.lt.u32.totalorder %s874_s4, %s1015_s1 }
  0x19   :  { %p880_p10 = pnand %p878_p9, %p875_p8 }
  0x1b   :  { %883 = shalt.err (!%p880_p10)
}
  0x1c   :  { %s884_s9 = scalar_lea.vmem %s29_s28, 12544  ;;  %p889_p12 = scmp.lt.s32.totalorder %s29_s28, %s29_s28 }
  0x1d   :  { %p885_p11 = scmp.ne.s32.totalorder %s29_s28, %s884_s9  ;;  %p890_p13 = scmp.lt.s32.totalorder %s884_s9, %s884_s9 }
  0x1f   :  { %p891_p0 = por %p890_p13, %p889_p12 }
  0x21   :  { %p892_p1 = pnand %p891_p0, %p885_p11 }
  0x23   :  { %895 = shalt.err (!%p892_p1)
}
  0x24   :  { %s928_s0 = smov 128   ;;  %s929_s10 = smov 8  }
  0x25   :  { %34 = dma.hbm_to_vmem [thread:$0]  %s1015_s1, 12544, %s29_s28, [#allocation6], %s928_s0, %s928_s0, %s929_s10  }
  0x26   :  { %918 = dma.done.wait [#allocation3], 896  }
  0x27   :  { %919 = vsyncadd [#allocation3], 4294966400 }
  0x28   :  { %920 = dma.done.wait [#allocation6], 12544  }
  0x29   :  { %921 = vsyncadd [#allocation6], 4294954752  ;;  %v67_v0 = vld [vmem:[#allocation5 + $0x80] sm:$0xff]  ;;  %v68_v1 = vld [vmem:[#allocation5 + $0x88] sm:$0xff]  ;;  %v930_v56 = vmov 1966171168   ;;  %v175_v58 = vlaneseq }
  0x2a   :  { %v51_v2 = vld [vmem:[#allocation5] sm:$0xff]  ;;  %v728_v3 = vpack.c.bf16 %v68_v1, %v67_v0  ;;  %v52_v4 = vld [vmem:[#allocation5 + $0x8] sm:$0xff]  ;;  %v69_v11 = vld [vmem:[#allocation5 + $0x90] sm:$0xff]  ;;  %v173_v57 = vunpack.c.l.s4 %v930_v56  ;;  %vm932_vm0 = vmmov 0   ;;  %vm305_vm1 = vcmask 130048  }
  0x2b   :  { %v99_v5 = vld [vmem:[#allocation5 + $0x180] sm:$0xff]  ;;  %v100_v6 = vld [vmem:[#allocation5 + $0x188] sm:$0xff]  ;;  %v730_v7 = vpack.c.bf16 %v52_v4, %v51_v2  ;;  %v70_v13 = vld [vmem:[#allocation5 + $0x98] sm:$0xff]  ;;  %vm590_vm2 = vcmask 80896  }
  0x2c   :  { %v760_v8 = vpack.c.bf16 %v100_v6, %v99_v5  ;;  %v83_v9 = vld [vmem:[#allocation5 + $0x100] sm:$0xff]  ;;  %v84_v10 = vld [vmem:[#allocation5 + $0x108] sm:$0xff]  ;;  %729 = vmatprep.subr.bf16.mxu0 %v728_v3  ;;  %v53_v14 = vld [vmem:[#allocation5 + $0x10] sm:$0xff]  ;;  %v732_v16 = vpack.c.bf16 %v70_v13, %v69_v11 }
  0x2d   :  { %v762_v12 = vpack.c.bf16 %v84_v10, %v83_v9  ;;  %v54_v15 = vld [vmem:[#allocation5 + $0x18] sm:$0xff]  ;;  %731 = vmatpush3.bf16.msra.mxu0 %v730_v7  ;;  %v101_v18 = vld [vmem:[#allocation5 + $0x190] sm:$0xff]  ;;  %v71_v23 = vld [vmem:[#allocation5 + $0xa0] sm:$0xff]  ;;  %v176_v9 = vshrl.u32 %v175_v58, 7 }
  0x2e   :  { %761 = vmatprep.subr.bf16.mxu1 %v760_v8  ;;  %v734_v17 = vpack.c.bf16 %v54_v15, %v53_v14  ;;  %v102_v19 = vld [vmem:[#allocation5 + $0x198] sm:$0xff]  ;;  %v85_v20 = vld [vmem:[#allocation5 + $0x110] sm:$0xff]  ;;  %v72_v24 = vld [vmem:[#allocation5 + $0xa8] sm:$0xff]  ;;  %733 = vmatprep.subr.bf16.mxu0 %v732_v16  ;;  %v174_v8 = vunpack.c.0.s8 %v173_v57 }
  0x2f   :  { %763 = vmatpush3.bf16.msra.mxu1 %v762_v12  ;;  %v764_v21 = vpack.c.bf16 %v102_v19, %v101_v18  ;;  %v86_v22 = vld [vmem:[#allocation5 + $0x118] sm:$0xff]  ;;  %v736_v26 = vpack.c.bf16 %v72_v24, %v71_v23  ;;  %v55_v27 = vld [vmem:[#allocation5 + $0x20] sm:$0xff]  ;;  %v56_v28 = vld [vmem:[#allocation5 + $0x28] sm:$0xff] }
  0x30   :  { %v766_v25 = vpack.c.bf16 %v86_v22, %v85_v20  ;;  %v103_v29 = vld [vmem:[#allocation5 + $0x1a0] sm:$0xff]  ;;  %v104_v30 = vld [vmem:[#allocation5 + $0x1a8] sm:$0xff]  ;;  %v738_v33 = vpack.c.bf16 %v56_v28, %v55_v27  ;;  %v73_v35 = vld [vmem:[#allocation5 + $0xb0] sm:$0xff] }
  0x31   :  { %765 = vmatprep.subr.bf16.mxu1 %v764_v21  ;;  %v87_v31 = vld [vmem:[#allocation5 + $0x120] sm:$0xff]  ;;  %v88_v32 = vld [vmem:[#allocation5 + $0x128] sm:$0xff]  ;;  %735 = vmatpush3.bf16.msra.mxu0 %v734_v17  ;;  %v768_v34 = vpack.c.bf16 %v104_v30, %v103_v29  ;;  %v74_v36 = vld [vmem:[#allocation5 + $0xb8] sm:$0xff] }
  0x32   :  { %v57_v37 = vld [vmem:[#allocation5 + $0x30] sm:$0xff]  ;;  %737 = vmatprep.subr.bf16.mxu0 %v736_v26  ;;  %v770_v38 = vpack.c.bf16 %v88_v32, %v87_v31  ;;  %v740_v39 = vpack.c.bf16 %v74_v36, %v73_v35  ;;  %v58_v40 = vld [vmem:[#allocation5 + $0x38] sm:$0xff]  ;;  %v75_v46 = vld [vmem:[#allocation5 + $0xc0] sm:$0xff]  ;;  %v981_v26 = vsub.s32 %v174_v8, %v176_v9 }
  0x33   :  { %767 = vmatpush3.bf16.msra.mxu1 %v766_v25  ;;  %v105_v41 = vld [vmem:[#allocation5 + $0x1b0] sm:$0xff]  ;;  %v106_v42 = vld [vmem:[#allocation5 + $0x1b8] sm:$0xff]  ;;  %v76_v47 = vld [vmem:[#allocation5 + $0xc8] sm:$0xff]  ;;  %v742_v48 = vpack.c.bf16 %v58_v40, %v57_v37 }
  0x34   :  { %769 = vmatprep.subr.bf16.mxu1 %v768_v34  ;;  %v772_v43 = vpack.c.bf16 %v106_v42, %v105_v41  ;;  %v89_v44 = vld [vmem:[#allocation5 + $0x130] sm:$0xff]  ;;  %v90_v45 = vld [vmem:[#allocation5 + $0x138] sm:$0xff]  ;;  %v107_v49 = vld [vmem:[#allocation5 + $0x1c0] sm:$0xff]  ;;  %v744_v52 = vpack.c.bf16 %v76_v47, %v75_v46 }
  0x35   :  { %739 = vmatpush3.bf16.msra.mxu0 %v738_v33  ;;  %v108_v50 = vld [vmem:[#allocation5 + $0x1c8] sm:$0xff]  ;;  %v774_v51 = vpack.c.bf16 %v90_v45, %v89_v44  ;;  %v59_v53 = vld [vmem:[#allocation5 + $0x40] sm:$0xff]  ;;  %v77_v61 = vld [vmem:[#allocation5 + $0xd0] sm:$0xff] }
  0x36   :  { %741 = vmatprep.subr.bf16.mxu0 %v740_v39  ;;  %v60_v54 = vld [vmem:[#allocation5 + $0x48] sm:$0xff]  ;;  %v91_v55 = vld [vmem:[#allocation5 + $0x140] sm:$0xff]  ;;  %v776_v59 = vpack.c.bf16 %v108_v50, %v107_v49  ;;  %v78_v62 = vld [vmem:[#allocation5 + $0xd8] sm:$0xff] }
  0x37   :  { %771 = vmatpush3.bf16.msra.mxu1 %v770_v38  ;;  %v92_v60 = vld [vmem:[#allocation5 + $0x148] sm:$0xff]  ;;  %v109_v63 = vld [vmem:[#allocation5 + $0x1d0] sm:$0xff]  ;;  %v110_v0 = vld [vmem:[#allocation5 + $0x1d8] sm:$0xff]  ;;  %v746_v1 = vpack.c.bf16 %v60_v54, %v59_v53  ;;  %v748_v4 = vpack.c.bf16 %v78_v62, %v77_v61 }
  0x38   :  { %773 = vmatprep.subr.bf16.mxu1 %v772_v43  ;;  %v61_v2 = vld [vmem:[#allocation5 + $0x50] sm:$0xff]  ;;  %v778_v3 = vpack.c.bf16 %v92_v60, %v91_v55  ;;  %v62_v5 = vld [vmem:[#allocation5 + $0x58] sm:$0xff]  ;;  %v780_v10 = vpack.c.bf16 %v110_v0, %v109_v63  ;;  %v79_v11 = vld [vmem:[#allocation5 + $0xe0] sm:$0xff] }
  0x39   :  { %743 = vmatpush3.bf16.msra.mxu0 %v742_v48  ;;  %v93_v6 = vld [vmem:[#allocation5 + $0x150] sm:$0xff]  ;;  %v94_v7 = vld [vmem:[#allocation5 + $0x158] sm:$0xff]  ;;  %v80_v12 = vld [vmem:[#allocation5 + $0xe8] sm:$0xff]  ;;  %v750_v19 = vpack.c.bf16 %v62_v5, %v61_v2 }
  0x3a   :  { %745 = vmatprep.subr.bf16.mxu0 %v744_v52  ;;  %v111_v13 = vld [vmem:[#allocation5 + $0x1e0] sm:$0xff]  ;;  %v64_v15 = vld [vmem:[#allocation5 + $0x68] sm:$0xff]  ;;  %v81_v20 = vld [vmem:[#allocation5 + $0xf0] sm:$0xff]  ;;  %v782_v22 = vpack.c.bf16 %v94_v7, %v93_v6  ;;  %v752_v23 = vpack.c.bf16 %v80_v12, %v79_v11 }
  0x3b   :  { %775 = vmatpush3.bf16.msra.mxu1 %v774_v51  ;;  %v63_v14 = vld [vmem:[#allocation5 + $0x60] sm:$0xff]  ;;  %v112_v16 = vld [vmem:[#allocation5 + $0x1e8] sm:$0xff]  ;;  %v82_v21 = vld [vmem:[#allocation5 + $0xf8] sm:$0xff] }
  0x3c   :  { %777 = vmatprep.subr.bf16.mxu1 %v776_v59  ;;  %v95_v17 = vld [vmem:[#allocation5 + $0x160] sm:$0xff]  ;;  %v96_v18 = vld [vmem:[#allocation5 + $0x168] sm:$0xff]  ;;  %v113_v24 = vld [vmem:[#allocation5 + $0x1f0] sm:$0xff]  ;;  %v784_v27 = vpack.c.bf16 %v112_v16, %v111_v13  ;;  %v754_v32 = vpack.c.bf16 %v64_v15, %v63_v14  ;;  %v756_v36 = vpack.c.bf16 %v82_v21, %v81_v20  ;;  %v931_v14 = vmov 0.0|0.0  }
  0x3d   :  { %747 = vmatpush3.bf16.msra.mxu0 %v746_v1  ;;  %v114_v25 = vld [vmem:[#allocation5 + $0x1f8] sm:$0xff]  ;;  %v65_v28 = vld [vmem:[#allocation5 + $0x70] sm:$0xff]  ;;  %v786_v33 = vpack.c.bf16 %v96_v18, %v95_v17  ;;  %v846_v37 = vld [vmem:[#allocation2 + $0x1c] ss:$7 sps:$4 sm:$0xff]  }
  0x3e   :  { %749 = vmatprep.subr.bf16.mxu0 %v748_v4  ;;  %v66_v29 = vld [vmem:[#allocation5 + $0x78] sm:$0xff]  ;;  %v840_v30 = vld [vmem:[#allocation2] ss:$7 sps:$4 sm:$0xff]   ;;  %v842_v34 = vld [vmem:[#allocation2 + $0x4] ss:$7 sps:$4 sm:$0x77]   ;;  %v788_v42 = vpack.c.bf16 %v114_v25, %v113_v24  ;;  %v206_v47 = vrot.slane %v846_v37, %v981_v26 }
  0x3f   :  { %779 = vmatpush3.bf16.msra.mxu1 %v778_v3  ;;  %v843_v31 = vld [vmem:[#allocation2 + $0xe] ss:$7 sps:$4 sm:$0xff]   ;;  %v845_v35 = vld [vmem:[#allocation2 + $0x12] ss:$7 sps:$4 sm:$0x77]   ;;  %v178_v39 = vrot.slane %v840_v30, %v981_v26  ;;  %v185_v46 = vrot.slane %v842_v34, %v981_v26  ;;  %v132_v51 = vld [vmem:[#allocation5 + $0x288] sm:$0xff]  ;;  %v758_v53 = vpack.c.bf16 %v66_v29, %v65_v28 }
  0x40   :  { %781 = vmatprep.subr.bf16.mxu1 %v780_v10  ;;  %v848_v38 = vld [vmem:[#allocation2 + $0x20] ss:$7 sps:$4 sm:$0x77]   ;;  %v192_v40 = vrot.slane %v843_v31, %v981_v26  ;;  %v849_v43 = vld [vmem:[#allocation2 + $0x2a] ss:$7 sps:$4 sm:$0xff]   ;;  %v131_v50 = vld [vmem:[#allocation5 + $0x280] sm:$0xff]  ;;  %v199_v52 = vrot.slane %v845_v35, %v981_v26 }
  0x41   :  { %751 = vmatpush3.bf16.msra.mxu0 %v750_v19  ;;  %v97_v41 = vld [vmem:[#allocation5 + $0x170] sm:$0xff]  ;;  %v98_v45 = vld [vmem:[#allocation5 + $0x178] sm:$0xff]  ;;  %v220_v54 = vrot.slane %v849_v43, %v981_v26  ;;  %v213_v55 = vrot.slane %v848_v38, %v981_v26  ;;  %v792_v58 = vpack.c.bf16 %v132_v51, %v131_v50  ;;  %v115_v63 = vld [vmem:[#allocation5 + $0x200] sm:$0xff]  ;;  %v933_v29 = vmov 0.0  }
  0x42   :  { %753 = vmatprep.subr.bf16.mxu0 %v752_v23  ;;  %v851_v44 = vld [vmem:[#allocation2 + $0x2e] ss:$7 sps:$4 sm:$0x77]   ;;  %v229_v48 = vcombine.high %v178_v39, %v192_v40  ;;  %v228_v49 = vcombine.low %v178_v39, %v192_v40  ;;  %v790_v57 = vpack.c.bf16 %v98_v45, %v97_v41  ;;  %v116_v0 = vld [vmem:[#allocation5 + $0x208] sm:$0xff]  ;;  %v231_v1 = vcombine.high %v185_v46, %v199_v52  ;;  %v135_v19 = vld [vmem:[#allocation5 + $0x2a0] sm:$0xff] }
  0x43   :  { %783 = vmatpush3.bf16.msra.mxu1 %v782_v22  ;;  %v227_v56 = vrot.slane %v851_v44, %v981_v26  ;;  %v233_v59 = vcombine.high %v206_v47, %v220_v54  ;;  %v232_v61 = vcombine.low %v206_v47, %v220_v54  ;;  %v133_v5 = vld [vmem:[#allocation5 + $0x290] sm:$0xff]  ;;  %v134_v6 = vld [vmem:[#allocation5 + $0x298] sm:$0xff]  ;;  %v794_v7 = vpack.c.bf16 %v116_v0, %v115_v63  ;;  %v136_v20 = vld [vmem:[#allocation5 + $0x2a8] sm:$0xff] }
  0x44   :  { %785 = vmatprep.subr.bf16.mxu1 %v784_v27  ;;  %v256_v60 = vrot.slane %v229_v48, %v981_v26  ;;  %v242_v62 = vrot.slane %v228_v49, %v981_v26  ;;  %v263_v8 = vrot.slane %v231_v1, %v981_v26  ;;  %v230_v9 = vcombine.low %v185_v46, %v199_v52  ;;  %v117_v16 = vld [vmem:[#allocation5 + $0x210] sm:$0xff]  ;;  %v118_v17 = vld [vmem:[#allocation5 + $0x218] sm:$0xff]  ;;  %v147_v23 = vld [vmem:[#allocation5 + $0x300] sm:$0xff] }
  0x45   :  { %755 = vmatpush3.bf16.msra.mxu0 %v754_v32  ;;  %v235_v2 = vcombine.high %v213_v55, %v227_v56  ;;  %v284_v3 = vrot.slane %v233_v59, %v981_v26  ;;  %v270_v4 = vrot.slane %v232_v61, %v981_v26  ;;  %v796_v15 = vpack.c.bf16 %v134_v6, %v133_v5  ;;  %v148_v28 = vld [vmem:[#allocation5 + $0x308] sm:$0xff]  ;;  %v119_v31 = vld [vmem:[#allocation5 + $0x220] sm:$0xff]  ;;  %v137_v34 = vld [vmem:[#allocation5 + $0x2b0] sm:$0xff] }
  0x46   :  { %757 = vmatprep.subr.bf16.mxu0 %v756_v36  ;;  %v234_v21 = vcombine.low %v213_v55, %v227_v56  ;;  %v798_v24 = vpack.c.bf16 %v118_v17, %v117_v16  ;;  %v249_v25 = vrot.slane %v230_v9, %v981_v26  ;;  %v800_v30 = vpack.c.bf16 %v136_v20, %v135_v19  ;;  %v120_v32 = vld [vmem:[#allocation5 + $0x228] sm:$0xff]  ;;  %v138_v35 = vld [vmem:[#allocation5 + $0x2b8] sm:$0xff]  ;;  %v139_v40 = vld [vmem:[#allocation5 + $0x2c0] sm:$0xff] }
  0x47   :  { %787 = vmatpush3.bf16.msra.mxu1 %v786_v33  ;;  %v296_v10 = vcombine.low %v256_v60, %v284_v3  ;;  %v292_v11 = vcombine.low %v242_v62, %v270_v4  ;;  %v297_v12 = vcombine.high %v256_v60, %v284_v3  ;;  %v293_v13 = vcombine.high %v242_v62, %v270_v4  ;;  %v122_v39 = vld [vmem:[#allocation5 + $0x238] sm:$0xff]  ;;  %v140_v41 = vld [vmem:[#allocation5 + $0x2c8] sm:$0xff]  ;;  %v123_v44 = vld [vmem:[#allocation5 + $0x240] sm:$0xff] }
  0x48   :  { %789 = vmatprep.subr.bf16.mxu1 %v788_v42  ;;  %v291_v18 = vrot.slane %v235_v2, %v981_v26  ;;  %v277_v27 = vrot.slane %v234_v21, %v981_v26  ;;  %v825_v33 = vpack.c.bf16 %v148_v28, %v147_v23  ;;  %v802_v37 = vpack.c.bf16 %v120_v32, %v119_v31  ;;  %v121_v26 = vld [vmem:[#allocation5 + $0x230] sm:$0xff]  ;;  %v124_v45 = vld [vmem:[#allocation5 + $0x248] sm:$0xff]  ;;  %v142_v47 = vld [vmem:[#allocation5 + $0x2d8] sm:$0xff] }
  0x49   :  { %759 = vmatpush3.bf16.msra.mxu0 %v758_v53  ;;  %372 = vmatprep.mubr.f32.mxu0 %v296_v10  ;;  %v804_v38 = vpack.c.bf16 %v138_v35, %v137_v34  ;;  %v806_v42 = vpack.c.bf16 %v122_v39, %v121_v26  ;;  %v808_v43 = vpack.c.bf16 %v140_v41, %v139_v40  ;;  %v141_v46 = vld [vmem:[#allocation5 + $0x2d0] sm:$0xff]  ;;  %v126_v51 = vld [vmem:[#allocation5 + $0x258] sm:$0xff]  ;;  %v143_v52 = vld [vmem:[#allocation5 + $0x2e0] sm:$0xff] }
  0x4a   :  { %793 = vmatprep.subr.bf16.mxu0 %v792_v58  ;;  %442 = vmatprep.mubr.f32.mxu1 %v297_v12  ;;  %v298_v22 = vcombine.low %v263_v8, %v291_v18  ;;  %v295_v36 = vcombine.high %v249_v25, %v277_v27  ;;  %v810_v48 = vpack.c.bf16 %v124_v45, %v123_v44  ;;  %v125_v50 = vld [vmem:[#allocation5 + $0x250] sm:$0xff]  ;;  %v144_v53 = vld [vmem:[#allocation5 + $0x2e8] sm:$0xff]  ;;  %v127_v56 = vld [vmem:[#allocation5 + $0x260] sm:$0xff] }
  0x4b   :  { %791 = vmatpush3.bf16.msra.mxu1 %v790_v57  ;;  %v812_v49 = vpack.c.bf16 %v142_v47, %v141_v46  ;;  %v814_v54 = vpack.c.bf16 %v126_v51, %v125_v50  ;;  %v816_v55 = vpack.c.bf16 %v144_v53, %v143_v52  ;;  %v128_v57 = vld [vmem:[#allocation5 + $0x268] sm:$0xff]  ;;  %v145_v58 = vld [vmem:[#allocation5 + $0x2f0] sm:$0xff]  ;;  %v146_v59 = vld [vmem:[#allocation5 + $0x2f8] sm:$0xff]  ;;  %v294_v1 = vcombine.low %v249_v25, %v277_v27 }
  0x4c   :  { %824 = vmatprep.subr.bf16.mxu1 %v931_v14  ;;  %373 = vmatmul.mubr.f32.vlgmr.msra.gmra.mrb[0].mxu0 %v292_v11  ;;  %v818_v60 = vpack.c.bf16 %v128_v57, %v127_v56  ;;  %v820_v61 = vpack.c.bf16 %v146_v59, %v145_v58  ;;  %v129_v62 = vld [vmem:[#allocation5 + $0x270] sm:$0xff]  ;;  %v130_v63 = vld [vmem:[#allocation5 + $0x278] sm:$0xff]  ;;  %v610_v4 = vld [vmem:[%s1016_s2] ss:$0 sm:$0xff] }
  0x4d   :  { %795 = vmatpush3.bf16.msra.mxu0 %v794_v7  ;;  %512 = vmatprep.mubr.f32.mxu0 %v298_v22  ;;  %v822_v0 = vpack.c.bf16 %v130_v63, %v129_v62 }
  0x4e   :  { %443 = vmatmul.mubr.f32.vlgmr.msra.gmra.mrb[0].mxu1 %v293_v13  ;;  %797 = vmatprep.subr.bf16.mxu0 %v796_v15 }
  0x4f   :  { %725 = vmatprep.mubr.msk.f32.mxu1 %vm932_vm0, %v933_v29  ;;  %826 = vmatpush3.bf16.msra.mxu1 %v825_v33 }
  0x51   :  { %799 = vmatpush3.bf16.msra.mxu0 %v798_v24 }
  0x52   :  { %801 = vmatprep.subr.bf16.mxu0 %v800_v30  ;;  %726 = vmatmul.mubr.msk.f32.vlgmr.msra.gmra.mrb[2].mxu1 %vm305_vm1, %v295_v36 }
  0x55   :  { %803 = vmatpush3.bf16.msra.mxu0 %v802_v37 }
  0x56   :  { %805 = vmatprep.subr.bf16.mxu0 %v804_v38 }
  0x59   :  { %807 = vmatpush3.bf16.msra.mxu0 %v806_v42 }
  0x5a   :  { %809 = vmatprep.subr.bf16.mxu0 %v808_v43 }
  0x5d   :  { %811 = vmatpush3.bf16.msra.mxu0 %v810_v48 }
  0x5e   :  { %813 = vmatprep.subr.bf16.mxu0 %v812_v49 }
  0x61   :  { %815 = vmatpush3.bf16.msra.mxu0 %v814_v54 }
  0x62   :  { %817 = vmatprep.subr.bf16.mxu0 %v816_v55 }
  0x65   :  { %819 = vmatpush3.bf16.msra.mxu0 %v818_v60 }
  0x66   :  { %821 = vmatprep.subr.bf16.mxu0 %v820_v61 }
  0x69   :  { %823 = vmatpush3.bf16.msra.mxu0 %v822_v0 }
  0x6c   :  { %513 = vmatmul.mubr.f32.vlgmr.msra.gmra.mrb[2].mxu0 %v294_v1 }
 0x11f   :  { %v645_v2 = vpop.f32.mrb[0].mxu0 }
 0x120   :  { %v646_v5 = vpop.f32.mrb[1].mxu0 }
 0x121   :  { %v680_v3 = vpop.f32.mrb[0].mxu1  ;;  %v647_v7 = vadd.f32 %v646_v5, %v645_v2 }
 0x122   :  { %v681_v6 = vpop.f32.mrb[1].mxu1 }
 0x123   :  { %v682_v8 = vadd.f32 %v681_v6, %v680_v3  ;;  %v375_v9 = vadd.f32 %v647_v7, %v610_v4 }
 0x125   :  { %v445_v10 = vadd.f32 %v682_v8, %v375_v9  ;;  %v584_v11 = vpop.f32.mrb[2].mxu1 }
 0x126   :  { %v727_v12 = vpop.f32.mrb[3].mxu1 }
 0x13f   :  { %v715_v13 = vpop.f32.mrb[2].mxu0 }
 0x140   :  { %v716_v14 = vpop.f32.mrb[3].mxu0 }
 0x141   :  { %v717_v15 = vadd.f32 %v716_v14, %v715_v13 }
 0x143   :  { %v515_v16 = vadd.f32 %v717_v15, %v445_v10 }
 0x145   :  { %v585_v17 = vadd.f32 %v584_v11, %v515_v16 }
 0x147   :  { %v612_v18 = vclamps-f32 %v585_v17, 15.0 }
 0x149   :  { %591 = vst.msk [vmem:[#allocation7] sm:$0xff] %vm590_vm2, %v612_v18 }
 0x14a   :  { %596 = vsyncadd [#allocation4], 112  ;;  %s934_s14 = smov [#allocation7]  }
 0x14b   :  { %s597_s15 = sshll.u32 %s934_s14, 4  ;;  %s598_s15 = int_to_ptr.vmem [resolvable:$true] %s597_s15 }
 0x14c   :  { %s896_s2 = scalar_lea.vmem %s598_s15, 16  ;;  %s900_s16 = scalar_lea.vmem %s598_s15, 128 }
 0x14d   :  { %p897_p2 = scmp.ne.s32.totalorder %s598_s15, %s896_s2  ;;  %p901_p3 = scmp.lt.s32.totalorder %s598_s15, %s598_s15 }
 0x14e   :  { %p902_p4 = scmp.lt.s32.totalorder %s900_s16, %s896_s2 }
 0x150   :  { %p903_p5 = por %p902_p4, %p901_p3 }
 0x152   :  { %p904_p6 = pnand %p903_p5, %p897_p2 }
 0x154   :  { %907 = shalt.err (!%p904_p6)
}
 0x155   :  { %s908_s19 = scalar_lea.hbm %s1017_s3, 16 }
 0x156   :  { %p909_p7 = scmp.ne.s32.totalorder %s1017_s3, %s908_s19  ;;  %p912_p8 = scmp.lt.u32.totalorder %s908_s19, %s1017_s3 }
 0x158   :  { %p914_p9 = pnand %p912_p8, %p909_p7 }
 0x15a   :  { %917 = shalt.err (!%p914_p9)
}
 0x15b   :  { %s935_s24 = smov 16   ;;  %s936_s25 = smov 1  }
 0x15c   :  { %603 = dma.vmem_to_hbm [thread:$0]  %s598_s15, 16, %s1017_s3, [#allocation4], %s935_s24, %s935_s24, %s936_s25  }
 0x15d   :  { %922 = dma.done.wait [#allocation4], 128  }
 0x15e   :  { %923 = vsyncadd [#allocation4], 4294967168 }
 0x15f   :  { %607 = vsyncpa [#allocation3], 1 }
 0x160   :  { %608 = vsyncpa [#allocation6], 1 }
 0x161   :  { %609 = vsyncpa [#allocation4], 1 }

</bundles_post_ra>
